<compile_context>
chip_gen: v6e
topology: v6e:2x2x1
jax: 0.10.0
libtpu: 0.0.40
codegen_flags: <defaults>
</compile_context>

<pallas_src>
import functools

import jax
import jax.numpy as jnp
from jax import lax
from jax.experimental import pallas as pl
from jax.experimental.pallas import tpu as pltpu

LANE = 128
SUBLANES = 8
MAX_BLOCK_ROWS = 8192            # (8192,128) f32 block = 4 MiB
SMALL_INPUT_THRESHOLD = 1 << 15  # below this, pure-JAX path is faster
VMEM_LIMIT_BYTES = 40 * 1024 * 1024  # 2 inputs x 2 bufs x 4 MiB + headroom


@functools.lru_cache(maxsize=1)
def _tensorcores_per_chip():
    """Split the row range only on chips with 2 TensorCores per chip (v7x)."""
    try:
        kind = jax.devices()[0].device_kind.lower()
    except Exception:  # pragma: no cover - defensive
        return 1
    return 2 if ("v7" in kind or "7x" in kind) else 1


def _hitrate_kernel(pred_ref, targ_ref, hits_ref, valid_ref, *,
                    threshold, inner, total_blocks, tail_rows,
                    mask_tail, has_dupes):
    part = pl.program_id(0)
    i = pl.program_id(1)
    block_rows = pred_ref.shape[0]

    # Output block is constant over the inner ("arbitrary") axis -> it is the
    # resident accumulator.  Initialize once per part.
    @pl.when(i == 0)
    def _():
        hits_ref[...] = jnp.zeros_like(hits_ref)
        valid_ref[...] = jnp.zeros_like(valid_ref)

    def accumulate(row_mask):
        pred = pred_ref[...].astype(jnp.float32)
        targ = targ_ref[...].astype(jnp.float32)
        valid = targ > 0.0
        hits = (jnp.abs(pred - targ) < jnp.float32(threshold)) & valid
        if row_mask is not None:
            valid = valid & row_mask
            hits = hits & row_mask
        # Tree-reduce this step's booleans down to (8, LANE) int32 partials:
        # pure VPU vreg adds, so the accumulators only see one vreg
        # load + add + store each per grid step.
        h = jnp.sum(hits.astype(jnp.int32).reshape(-1, SUBLANES, LANE), axis=0)
        v = jnp.sum(valid.astype(jnp.int32).reshape(-1, SUBLANES, LANE), axis=0)
        hits_ref[...] += h
        valid_ref[...] += v

    last = total_blocks - 1
    b = part * inner + i  # logical (unclamped) block index

    if mask_tail:
        # Fast unmasked path for all interior blocks ...
        @pl.when(b < last)
        def _():
            accumulate(None)

        # ... masked path only for the single ragged last block.  Blocks with
        # b > last are the clamped duplicates and are skipped entirely.
        @pl.when(b == last)
        def _():
            row = lax.broadcasted_iota(jnp.int32, (block_rows, LANE), 0)
            accumulate(row < tail_rows)
    elif has_dupes:
        # Tail block is full; only the clamped duplicate block must be skipped.
        @pl.when(b <= last)
        def _():
            accumulate(None)
    else:
        # Rows divide evenly and there are no duplicates: straight-line body.
        accumulate(None)


def hit_rate(predicted, target, threshold=0.2, use_pallas=None):
    """Pallas TPU implementation of the HitRate metric (device scalar f32).

    Wrap in float() for a host float (mirrors .item() of the PyTorch module).
    """
    assert predicted.shape == target.shape
    n = int(predicted.size)
    if n == 0:
        return jnp.float32(0.0)

    if use_pallas is None:
        use_pallas = n >= SMALL_INPUT_THRESHOLD
    if not use_pallas:
        return hit_rate_ref(predicted, target, threshold)

    p_flat = predicted.reshape(-1)
    t_flat = target.reshape(-1)

    # Pad only when needed: flat length must be a multiple of LANE and cover
    # at least 8 sublane rows.  Zero padding is safe since target == 0 is
    # never a valid element, so padding contributes to neither count.
    padded_n = max(pl.cdiv(n, LANE) * LANE, SUBLANES * LANE)
    if padded_n != n:
        p_flat = jnp.pad(p_flat, (0, padded_n - n))
        t_flat = jnp.pad(t_flat, (0, padded_n - n))

    rows = padded_n // LANE
    p2 = p_flat.reshape(rows, LANE)
    t2 = t_flat.reshape(rows, LANE)

    # Largest sublane-aligned block that fits comfortably in VMEM.
    block_rows = min(MAX_BLOCK_ROWS, (rows // SUBLANES) * SUBLANES)
    total_blocks = pl.cdiv(rows, block_rows)
    tail_rows = rows - (total_blocks - 1) * block_rows   # rows valid in last block

    num_parts = _tensorcores_per_chip()
    inner = pl.cdiv(total_blocks, num_parts)
    has_dupes = num_parts * inner > total_blocks          # static
    mask_tail = tail_rows < block_rows                    # static

    def in_map(part, i):
        # Clamp so the DMA never targets a fully out-of-range block; the
        # kernel skips the duplicate clamped block via its logical index.
        return (jnp.minimum(part * inner + i, total_blocks - 1), 0)

    out_map = lambda part, i: (part, 0)

    if num_parts > 1:
        # Genuine per-TensorCore split of the leading axis on v7x.
        dim_sem = (getattr(pltpu, "CORE_PARALLEL", "parallel"),
                   getattr(pltpu, "ARBITRARY", "arbitrary"))
    else:
        dim_sem = ("arbitrary", "arbitrary")

    kernel = functools.partial(
        _hitrate_kernel,
        threshold=float(threshold),
        inner=int(inner),
        total_blocks=int(total_blocks),
        tail_rows=int(tail_rows),
        mask_tail=bool(mask_tail),
        has_dupes=bool(has_dupes),
    )

    hits_part, valid_part = pl.pallas_call(
        kernel,
        out_shape=(
            jax.ShapeDtypeStruct((num_parts * SUBLANES, LANE), jnp.int32),
            jax.ShapeDtypeStruct((num_parts * SUBLANES, LANE), jnp.int32),
        ),
        grid_spec=pltpu.PrefetchScalarGridSpec(
            num_scalar_prefetch=0,
            grid=(num_parts, inner),
            in_specs=[
                pl.BlockSpec((block_rows, LANE), in_map),
                pl.BlockSpec((block_rows, LANE), in_map),
            ],
            out_specs=(
                pl.BlockSpec((SUBLANES, LANE), out_map),
                pl.BlockSpec((SUBLANES, LANE), out_map),
            ),
        ),
        compiler_params=pltpu.CompilerParams(
            dimension_semantics=dim_sem,
            vmem_limit_bytes=VMEM_LIMIT_BYTES,
        ),
    )(p2, t2)

    # Final tiny cross-lane/part reduction + divide in the wrapper.
    num_hits = jnp.sum(hits_part).astype(jnp.float32)
    num_valid = jnp.sum(valid_part).astype(jnp.float32)
    return jnp.where(num_valid > 0.0, num_hits / num_valid, jnp.float32(0.0))


def hit_rate_ref(predicted, target, threshold=0.2):
    """Pure-JAX reference mirroring the PyTorch module."""
    predicted = predicted.astype(jnp.float32)
    target = target.astype(jnp.float32)
    mask = target > 0
    diff = jnp.abs(predicted - target)
    hits = (diff < jnp.float32(threshold)) & mask
    num_hits = jnp.sum(hits.astype(jnp.float32))
    num_valid = jnp.sum(mask.astype(jnp.float32))
    return jnp.where(num_valid > 0, num_hits / num_valid, jnp.float32(0.0))


if __name__ == "__main__":
    key = jax.random.PRNGKey(0)
    k1, k2 = jax.random.split(key)

    # Small shape consistent with a dense-prediction metric input (NCHW-like).
    shape = (2, 4, 16, 16)
    predicted = jax.random.uniform(k1, shape, dtype=jnp.float32)
    # target: mix of positive values and zeros/negatives so mask is non-trivial
    target = jax.random.uniform(k2, shape, dtype=jnp.float32, minval=-0.5, maxval=1.0)

    # Force the Pallas path even though this test input is below the
    # small-input bypass threshold.
    result = hit_rate(predicted, target, threshold=0.2, use_pallas=True)
    result = jax.block_until_ready(result)

    ref = jax.block_until_ready(hit_rate_ref(predicted, target, threshold=0.2))
    assert abs(float(result) - float(ref)) < 1e-6, (float(result), float(ref))

    print("KERNEL_OK")
</pallas_src>

<mosaic_0001>
module attributes {stable_mosaic.version = 11 : i64} {
  func.func @_hitrate_kernel(%arg0: i32, %arg1: i32, %arg2: memref<16x128xf32, #tpu.memory_space<vmem>>, %arg3: memref<16x128xf32, #tpu.memory_space<vmem>>, %arg4: memref<8x128xi32, #tpu.memory_space<vmem>>, %arg5: memref<8x128xi32, #tpu.memory_space<vmem>>) attributes {dimension_semantics = [#tpu.dimension_semantics<arbitrary>, #tpu.dimension_semantics<arbitrary>], iteration_bounds = array<i64: 1, 1>, scalar_prefetch = 0 : i64, scratch_operands = 0 : i64, tpu.core_type = #tpu.core_type<tc>, window_params = [{transform_indices = @transform_0, window_bounds = array<i64: 16, 128>}, {transform_indices = @transform_1, window_bounds = array<i64: 16, 128>}, {transform_indices = @transform_2, window_bounds = array<i64: 8, 128>}, {transform_indices = @transform_3, window_bounds = array<i64: 8, 128>}]} {
    %c0_i32 = arith.constant 0 : i32
    %0 = arith.cmpi eq, %arg1, %c0_i32 : i32
    %1 = arith.extui %0 : i1 to i32
    %c0_i32_0 = arith.constant 0 : i32
    %2 = arith.cmpi ne, %1, %c0_i32_0 : i32
    scf.if %2 {
      %c0_i32_15 = arith.constant 0 : i32
      %24 = vector.broadcast %c0_i32_15 : i32 to vector<8x128xi32>
      %c0_16 = arith.constant 0 : index
      %c0_17 = arith.constant 0 : index
      %25 = vector.load %arg4[%c0_16, %c0_17] : memref<8x128xi32, #tpu.memory_space<vmem>>, vector<8x128xi32>
      tpu.vector_store %arg4[%c0_16, %c0_17], %24 {strides = array<i32>} : memref<8x128xi32, #tpu.memory_space<vmem>>, vector<8x128xi32>,
      %c0_i32_18 = arith.constant 0 : i32
      %26 = vector.broadcast %c0_i32_18 : i32 to vector<8x128xi32>
      %c0_19 = arith.constant 0 : index
      %c0_20 = arith.constant 0 : index
      %27 = vector.load %arg5[%c0_19, %c0_20] : memref<8x128xi32, #tpu.memory_space<vmem>>, vector<8x128xi32>
      tpu.vector_store %arg5[%c0_19, %c0_20], %26 {strides = array<i32>} : memref<8x128xi32, #tpu.memory_space<vmem>>, vector<8x128xi32>,
    } else {
    }
    %c0 = arith.constant 0 : index
    %c0_1 = arith.constant 0 : index
    %3 = vector.load %arg2[%c0, %c0_1] : memref<16x128xf32, #tpu.memory_space<vmem>>, vector<16x128xf32>
    %c0_2 = arith.constant 0 : index
    %c0_3 = arith.constant 0 : index
    %4 = vector.load %arg3[%c0_2, %c0_3] : memref<16x128xf32, #tpu.memory_space<vmem>>, vector<16x128xf32>
    %cst = arith.constant 0.000000e+00 : f32
    %5 = vector.broadcast %cst : f32 to vector<16x128xf32>
    %6 = arith.cmpf ogt, %4, %5 : vector<16x128xf32>
    %7 = arith.subf %3, %4 : vector<16x128xf32>
    %8 = math.absf %7 : vector<16x128xf32>
    %cst_4 = arith.constant 2.000000e-01 : f32
    %9 = vector.broadcast %cst_4 : f32 to vector<16x128xf32>
    %10 = arith.cmpf olt, %8, %9 : vector<16x128xf32>
    %11 = arith.andi %10, %6 : vector<16x128xi1>
    %12 = arith.extui %11 : vector<16x128xi1> to vector<16x128xi32>
    %13 = vector.shape_cast %12 : vector<16x128xi32> to vector<2x8x128xi32>
    %cst_5 = arith.constant dense<0> : vector<8x128xi32>
    %14 = vector.multi_reduction <add>, %13, %cst_5 [0] : vector<2x8x128xi32> to vector<8x128xi32>
    %15 = arith.extui %6 : vector<16x128xi1> to vector<16x128xi32>
    %16 = vector.shape_cast %15 : vector<16x128xi32> to vector<2x8x128xi32>
    %cst_6 = arith.constant dense<0> : vector<8x128xi32>
    %17 = vector.multi_reduction <add>, %16, %cst_6 [0] : vector<2x8x128xi32> to vector<8x128xi32>
    %c0_7 = arith.constant 0 : index
    %c0_8 = arith.constant 0 : index
    %18 = vector.load %arg4[%c0_7, %c0_8] : memref<8x128xi32, #tpu.memory_space<vmem>>, vector<8x128xi32>
    %19 = arith.addi %18, %14 : vector<8x128xi32>
    %c0_9 = arith.constant 0 : index
    %c0_10 = arith.constant 0 : index
    %20 = vector.load %arg4[%c0_9, %c0_10] : memref<8x128xi32, #tpu.memory_space<vmem>>, vector<8x128xi32>
    tpu.vector_store %arg4[%c0_9, %c0_10], %19 {strides = array<i32>} : memref<8x128xi32, #tpu.memory_space<vmem>>, vector<8x128xi32>,
    %c0_11 = arith.constant 0 : index
    %c0_12 = arith.constant 0 : index
    %21 = vector.load %arg5[%c0_11, %c0_12] : memref<8x128xi32, #tpu.memory_space<vmem>>, vector<8x128xi32>
    %22 = arith.addi %21, %17 : vector<8x128xi32>
    %c0_13 = arith.constant 0 : index
    %c0_14 = arith.constant 0 : index
    %23 = vector.load %arg5[%c0_13, %c0_14] : memref<8x128xi32, #tpu.memory_space<vmem>>, vector<8x128xi32>
    tpu.vector_store %arg5[%c0_13, %c0_14], %22 {strides = array<i32>} : memref<8x128xi32, #tpu.memory_space<vmem>>, vector<8x128xi32>,
    return
  }
  func.func @transform_0(%arg0: i32, %arg1: i32) -> (i32, i32) {
    %c1_i32 = arith.constant 1 : i32
    %0 = arith.muli %arg0, %c1_i32 : i32
    %1 = arith.addi %0, %arg1 : i32
    %c0_i32 = arith.constant 0 : i32
    %2 = arith.minsi %1, %c0_i32 : i32
    %c0_i32_0 = arith.constant 0 : i32
    %c0_i32_1 = arith.constant 0 : i32
    return %2, %c0_i32_0 : i32, i32
  }
  func.func @transform_1(%arg0: i32, %arg1: i32) -> (i32, i32) {
    %c1_i32 = arith.constant 1 : i32
    %0 = arith.muli %arg0, %c1_i32 : i32
    %1 = arith.addi %0, %arg1 : i32
    %c0_i32 = arith.constant 0 : i32
    %2 = arith.minsi %1, %c0_i32 : i32
    %c0_i32_0 = arith.constant 0 : i32
    %c0_i32_1 = arith.constant 0 : i32
    return %2, %c0_i32_0 : i32, i32
  }
  func.func @transform_2(%arg0: i32, %arg1: i32) -> (i32, i32) {
    %c0_i32 = arith.constant 0 : i32
    %c0_i32_0 = arith.constant 0 : i32
    return %arg0, %c0_i32 : i32, i32
  }
  func.func @transform_3(%arg0: i32, %arg1: i32) -> (i32, i32) {
    %c0_i32 = arith.constant 0 : i32
    %c0_i32_0 = arith.constant 0 : i32
    return %arg0, %c0_i32 : i32, i32
  }
}

</mosaic_0001>

<bundles_post_ra>
// kernel: tpu_custom_call.1
= control target key start
LH: loop header
LB: loop body
LE: loop exit
PB: predicated region body
PF: predicated region fallthrough
CT: control target
= control target key end

     0   :  { %9 = vsyncpa [#allocation3], 0  ;;  %s263_s0 = inlined_call_operand.hbm [shape: f32[16,128], index: 0, kind: input, shape index: {}]   ;;  %s264_s1 = inlined_call_operand.hbm [shape: f32[16,128], index: 1, kind: input, shape index: {}]   ;;  %s265_s2 = inlined_call_operand.hbm [shape: s32[8,128], index: 2, kind: output, shape index: {0}]   ;;  %s266_s3 = inlined_call_operand.hbm [shape: s32[8,128], index: 3, kind: output, shape index: {1}]  }
   0x1   :  { %10 = vsyncpa [#allocation6], 0 }
   0x2   :  { %11 = vsyncpa [#allocation4], 0 }
   0x3   :  { %12 = vsyncpa [#allocation9], 0  ;;  %s224_s12 = smov [#allocation2]  }
   0x4   :  { %s24_s13 = sshll.u32 %s224_s12, 4  ;;  %s25_s13 = int_to_ptr.vmem [resolvable:$true] %s24_s13 }
   0x5   :  { %s144_s14 = scalar_lea.vmem %s25_s13, 256  ;;  %p149_p1 = scmp.lt.s32.totalorder %s25_s13, %s25_s13 }
   0x6   :  { %p145_p0 = scmp.ne.s32.totalorder %s25_s13, %s144_s14  ;;  %p150_p2 = scmp.lt.s32.totalorder %s144_s14, %s144_s14 }
   0x8   :  { %p151_p3 = por %p150_p2, %p149_p1 }
   0xa   :  { %p152_p4 = pnand %p151_p3, %p145_p0 }
   0xc   :  { %155 = shalt.err (!%p152_p4)
}
   0xd   :  { %s225_s15 = smov 128   ;;  %s226_s16 = smov 8  }
   0xe   :  { %30 = dma.hbm_to_vmem [thread:$0]  %s263_s0, 256, %s25_s13, [#allocation3], %s225_s15, %s225_s15, %s226_s16  }
   0xf   :  { %s227_s19 = smov [#allocation5]  }
  0x10   :  { %s42_s20 = sshll.u32 %s227_s19, 4  ;;  %s43_s20 = int_to_ptr.vmem [resolvable:$true] %s42_s20 }
  0x11   :  { %s164_s21 = scalar_lea.vmem %s43_s20, 256  ;;  %p169_p6 = scmp.lt.s32.totalorder %s43_s20, %s43_s20 }
  0x12   :  { %p165_p5 = scmp.ne.s32.totalorder %s43_s20, %s164_s21  ;;  %p170_p7 = scmp.lt.s32.totalorder %s164_s21, %s164_s21 }
  0x14   :  { %p171_p8 = por %p170_p7, %p169_p6 }
  0x16   :  { %p172_p9 = pnand %p171_p8, %p165_p5 }
  0x18   :  { %175 = shalt.err (!%p172_p9)
}
  0x19   :  { %48 = dma.hbm_to_vmem [thread:$0]  %s264_s1, 256, %s43_s20, [#allocation6], %s225_s15, %s225_s15, %s226_s16  }
  0x1a   :  { %216 = dma.done.wait [#allocation3], 256  }
  0x1b   :  { %217 = vsyncadd [#allocation3], 4294967040 }
  0x1c   :  { %218 = dma.done.wait [#allocation6], 256  }
  0x1d   :  { %219 = vsyncadd [#allocation6], 4294967040  ;;  %v69_v0 = vld [vmem:[#allocation2] sm:$0xff]  ;;  %v70_v1 = vld [vmem:[#allocation2 + $0x8] sm:$0xff]  ;;  %v228_v6 = vmov 0   ;;  %s229_s0 = smov [#allocation8]  }
  0x1e   :  { %v71_v2 = vld [vmem:[#allocation5] sm:$0xff]  ;;  %v72_v3 = vld [vmem:[#allocation5 + $0x8] sm:$0xff]  ;;  %s111_s24 = sshll.u32 %s229_s0, 4  ;;  %s230_s1 = smov [#allocation7]   ;;  %s112_s24 = int_to_ptr.vmem [resolvable:$true] %s111_s24 }
  0x1f   :  { %vm73_vm0 = vcmp.gt.f32.partialorder %v71_v2, 0.0  ;;  %v75_v4 = vsub.f32 %v69_v0, %v71_v2  ;;  %vm74_vm1 = vcmp.gt.f32.partialorder %v72_v3, 0.0  ;;  %v76_v5 = vsub.f32 %v70_v1, %v72_v3  ;;  %s101_s25 = sshll.u32 %s230_s1, 4  ;;  %s176_s26 = scalar_lea.vmem %s112_s24, 128  ;;  %s102_s25 = int_to_ptr.vmem [resolvable:$true] %s101_s25 }
  0x20   :  { %v86_v7 = vsel %vm73_vm0, 1, %v228_v6  ;;  %v87_v9 = vsel %vm74_vm1, 1, %v228_v6  ;;  %p177_p10 = scmp.ne.s32.totalorder %s112_s24, %s176_s26  ;;  %p181_p11 = scmp.lt.s32.totalorder %s112_s24, %s112_s24 }
  0x21   :  { %v77_v8 = vand.u32 2147483647, %v75_v4  ;;  %v78_v10 = vand.u32 2147483647, %v76_v5  ;;  %v88_v11 = vadd.s32 %v87_v9, %v86_v7  ;;  %p182_p12 = scmp.lt.s32.totalorder %s176_s26, %s176_s26 }
  0x23   :  { %vm79_vm2 = vcmp.lt.f32.partialorder %v77_v8, 0.2  ;;  %vm80_vm3 = vcmp.lt.f32.partialorder %v78_v10, 0.2  ;;  %94 = vst [vmem:[#allocation8] sm:$0xff] %v88_v11  ;;  %p183_p13 = por %p182_p12, %p181_p11 }
  0x24   :  { %vm81_vm4 = vmand %vm79_vm2, %vm73_vm0 }
  0x25   :  { %vm82_vm5 = vmand %vm80_vm3, %vm74_vm1  ;;  %v83_v12 = vsel %vm81_vm4, 1, %v228_v6  ;;  %p184_p0 = pnand %p183_p13, %p177_p10 }
  0x26   :  { %v84_v13 = vsel %vm82_vm5, 1, %v228_v6 }
  0x27   :  { %v85_v14 = vadd.s32 %v84_v13, %v83_v12 }
  0x28   :  { %187 = shalt.err (!%p184_p0)
}
  0x29   :  { %114 = dma.vmem_to_hbm [thread:$0]  %s112_s24, 128, %s266_s3, [#allocation9]   ;;  %91 = vst [vmem:[#allocation7] sm:$0xff] %v85_v14 }
  0x2a   :  { %s196_s29 = scalar_lea.vmem %s102_s25, 128  ;;  %p201_p2 = scmp.lt.s32.totalorder %s102_s25, %s102_s25 }
  0x2b   :  { %p197_p1 = scmp.ne.s32.totalorder %s102_s25, %s196_s29  ;;  %p202_p3 = scmp.lt.s32.totalorder %s196_s29, %s196_s29 }
  0x2d   :  { %p203_p4 = por %p202_p3, %p201_p2 }
  0x2f   :  { %p204_p5 = pnand %p203_p4, %p197_p1 }
  0x31   :  { %207 = shalt.err (!%p204_p5)
}
  0x32   :  { %104 = dma.vmem_to_hbm [thread:$0]  %s102_s25, 128, %s265_s2, [#allocation4]  }
  0x33   :  { %220 = dma.done.wait [#allocation4], 128  }
  0x34   :  { %221 = vsyncadd [#allocation4], 4294967168 }
  0x35   :  { %222 = dma.done.wait [#allocation9], 128  }
  0x36   :  { %223 = vsyncadd [#allocation9], 4294967168 }
  0x37   :  { %121 = vsyncpa [#allocation3], 1 }
  0x38   :  { %122 = vsyncpa [#allocation6], 1 }
  0x39   :  { %123 = vsyncpa [#allocation4], 1 }
  0x3a   :  { %124 = vsyncpa [#allocation9], 1 }

</bundles_post_ra>
